<compile_context>
chip_gen: v5e
topology: v5e:2x2
jax: 0.10.0
libtpu: 0.0.40
codegen_flags: <defaults>
</compile_context>

<pallas_src>
import jax
import jax.numpy as jnp
import numpy as np
from jax.experimental import pallas as pl
from jax.experimental.pallas import tpu as pltpu

D_MODEL = 6
NHEAD = 2
D_HEAD = D_MODEL // NHEAD
D_FF = 2 * D_MODEL
EPS = 1e-5
NEG_INF = -1e30  # finite "minus infinity" -> exp underflows to exactly 0

# ---- packed-parameter slab layout (P_ROWS x 18 cols, f32) -----------------------
# All weights are pre-transposed to (in, out). Segment starts are 8-row aligned so
# every in-kernel row slice stays sublane-aligned.
P_COLS = 3 * D_MODEL          # 18
R_WQKV = 0                    # rows 0..5   : Wqkv^T (D, 3D); Q cols pre-scaled by 1/sqrt(Dh)
R_BQKV = 8                    # row  8      : bqkv   (3D,)  ; Q part pre-scaled
R_BO   = 9                    # row  9      : bo     (D,)
R_G1   = 10                   # row 10      : gamma1 (D,)
R_B1N  = 11                   # row 11      : beta1  (D,)
R_BF1  = 12                   # row 12      : b_ff1  (2D,)
R_BF2  = 13                   # row 13      : b_ff2  (D,)
R_G2   = 14                   # row 14      : gamma2 (D,)
R_B2N  = 15                   # row 15      : beta2  (D,)
R_WO_H = (16, 24)             # rows 16..18 / 24..26 : Wo^T rows for head 0 / head 1 (Dh, D)
R_W1   = 32                   # rows 32..37 : W1^T   (D, 2D)
R_W2   = 40                   # rows 40..51 : W2^T   (2D, D)
P_ROWS = 56


def _layernorm(h, gamma, beta):
    # ManualLayerNorm: population std (unbiased=False), eps added to the *std*.
    mean = jnp.mean(h, axis=-1, keepdims=True)
    var = jnp.mean((h - mean) ** 2, axis=-1, keepdims=True)
    return gamma * ((h - mean) / (jnp.sqrt(var) + EPS)) + beta


def _encoder_kernel(x_ref, p_ref, mask_ref, o_ref):
    x = x_ref[...]                                                    # (N, D)  f32
    mask_bias = mask_ref[...]                                         # (N, N)  0 / -1e30

    # ---- fused QKV projection: one MXU push for all heads & q/k/v ----
    wqkv = p_ref[R_WQKV:R_WQKV + D_MODEL, :]                          # (D, 3D)
    bqkv = p_ref[R_BQKV:R_BQKV + 1, :]                                # (1, 3D)
    qkv = jnp.dot(x, wqkv, preferred_element_type=jnp.float32) + bqkv  # (N, 3D)

    # ---- per-head attention; Wo applied per head (no lane concat) ----
    bo = p_ref[R_BO:R_BO + 1, 0:D_MODEL]                              # (1, D)
    proj = bo
    for h in range(NHEAD):                                            # static, NHEAD=2
        qh = qkv[:, h * D_HEAD:(h + 1) * D_HEAD]
        kh = qkv[:, D_MODEL + h * D_HEAD:D_MODEL + (h + 1) * D_HEAD]
        vh = qkv[:, 2 * D_MODEL + h * D_HEAD:2 * D_MODEL + (h + 1) * D_HEAD]
        # q @ k^T (scale already folded into q); block-diag batch mask as additive bias.
        s = jax.lax.dot_general(qh, kh, (((1,), (1,)), ((), ())),
                                preferred_element_type=jnp.float32) + mask_bias
        m = jnp.max(s, axis=-1, keepdims=True)
        e = jnp.exp(s - m)
        w = e / jnp.sum(e, axis=-1, keepdims=True)                    # exact divide
        attn_h = jnp.dot(w, vh, preferred_element_type=jnp.float32)   # (N, Dh)
        wo_h = p_ref[R_WO_H[h]:R_WO_H[h] + D_HEAD, 0:D_MODEL]         # (Dh, D), aligned rows
        proj = proj + jnp.dot(attn_h, wo_h, preferred_element_type=jnp.float32)

    # ---- residual + norm1 ----
    h1 = _layernorm(x + proj,
                    p_ref[R_G1:R_G1 + 1, 0:D_MODEL],
                    p_ref[R_B1N:R_B1N + 1, 0:D_MODEL])

    # ---- feed-forward + residual + norm2 ----
    w1 = p_ref[R_W1:R_W1 + D_MODEL, 0:D_FF]
    b1 = p_ref[R_BF1:R_BF1 + 1, 0:D_FF]
    ffh = jnp.maximum(jnp.dot(h1, w1, preferred_element_type=jnp.float32) + b1, 0.0)
    w2 = p_ref[R_W2:R_W2 + D_FF, 0:D_MODEL]
    b2 = p_ref[R_BF2:R_BF2 + 1, 0:D_MODEL]
    ff = jnp.dot(ffh, w2, preferred_element_type=jnp.float32) + b2
    out = _layernorm(h1 + ff,
                     p_ref[R_G2:R_G2 + 1, 0:D_MODEL],
                     p_ref[R_B2N:R_B2N + 1, 0:D_MODEL])

    o_ref[...] = out.astype(o_ref.dtype)                              # single store


def pack_params(p):
    """Pre-transpose every weight to (in, out), fold the 1/sqrt(Dh) scale into Q,
    and pack all 16 parameter tensors into one (P_ROWS, 18) f32 slab.
    Call this ONCE (outside the jitted per-step path) and reuse the slab."""
    scale = 1.0 / (D_HEAD ** 0.5)
    wq = p["wq"].reshape(D_MODEL, D_MODEL) * scale   # (out = H*Dh, in = D), pre-scaled
    bq = p["bq"].reshape(-1) * scale
    wk = p["wk"].reshape(D_MODEL, D_MODEL)
    wv = p["wv"].reshape(D_MODEL, D_MODEL)
    wqkv_t = jnp.concatenate([wq, wk, wv], axis=0).T                  # (D, 3D)
    bqkv = jnp.concatenate([bq, p["bk"].reshape(-1), p["bv"].reshape(-1)])  # (3D,)
    wo_t = p["wo"].T                                                  # (in = D, out = D)

    slab = jnp.zeros((P_ROWS, P_COLS), jnp.float32)
    slab = slab.at[R_WQKV:R_WQKV + D_MODEL, :].set(wqkv_t)
    slab = slab.at[R_BQKV, :].set(bqkv)
    slab = slab.at[R_BO, :D_MODEL].set(p["bo"].reshape(-1))
    slab = slab.at[R_G1, :D_MODEL].set(p["gamma1"].reshape(-1))
    slab = slab.at[R_B1N, :D_MODEL].set(p["beta1"].reshape(-1))
    slab = slab.at[R_BF1, :D_FF].set(p["b1"].reshape(-1))
    slab = slab.at[R_BF2, :D_MODEL].set(p["b2"].reshape(-1))
    slab = slab.at[R_G2, :D_MODEL].set(p["gamma2"].reshape(-1))
    slab = slab.at[R_B2N, :D_MODEL].set(p["beta2"].reshape(-1))
    for h in range(NHEAD):
        slab = slab.at[R_WO_H[h]:R_WO_H[h] + D_HEAD, :D_MODEL].set(
            wo_t[h * D_HEAD:(h + 1) * D_HEAD, :])
    slab = slab.at[R_W1:R_W1 + D_MODEL, :D_FF].set(p["w1"].T)
    slab = slab.at[R_W2:R_W2 + D_FF, :D_MODEL].set(p["w2"].T)
    return slab


def make_block_diag_bias(batch, seq):
    """Additive softmax bias (0 inside a batch element's block, -1e30 outside).
    Pure numpy -> built once at setup time, passed to the kernel as a constant input."""
    blk = np.kron(np.eye(batch, dtype=np.float32), np.ones((seq, seq), np.float32))
    return jnp.asarray(np.where(blk > 0, 0.0, NEG_INF).astype(np.float32))


@jax.jit
def simple_encoder_pallas(x, slab, mask_bias):
    B, S, D = x.shape
    assert D == D_MODEL
    n_tok = B * S
    x2d = x.reshape(n_tok, D)

    out2d = pl.pallas_call(
        _encoder_kernel,
        out_shape=jax.ShapeDtypeStruct((n_tok, D), x.dtype),
        # No grid: one invocation covers the whole (tiny) batch. Each operand is a
        # single whole-array VMEM block -> 3 input DMAs + 1 output store, no
        # per-grid-step overhead or weight double-buffering.
        in_specs=[pl.BlockSpec(memory_space=pltpu.MemorySpace.VMEM),
                  pl.BlockSpec(memory_space=pltpu.MemorySpace.VMEM),
                  pl.BlockSpec(memory_space=pltpu.MemorySpace.VMEM)],
        out_specs=pl.BlockSpec(memory_space=pltpu.MemorySpace.VMEM),
    )(x2d, slab, mask_bias)
    return out2d.reshape(B, S, D)


def simple_encoder_ref(x, p):
    """Pure-JAX reference matching the PyTorch forward exactly."""
    attn_outputs = []
    for i in range(NHEAD):
        q = x @ p["wq"][i].T + p["bq"][i]
        k = x @ p["wk"][i].T + p["bk"][i]
        v = x @ p["wv"][i].T + p["bv"][i]
        scores = (q @ jnp.swapaxes(k, -2, -1)) / (D_HEAD ** 0.5)
        weights = jax.nn.softmax(scores, axis=-1)
        attn_outputs.append(weights @ v)
    concat = jnp.concatenate(attn_outputs, axis=-1)
    proj = concat @ p["wo"].T + p["bo"][0]

    def ln(h, g, b):
        mean = jnp.mean(h, axis=-1, keepdims=True)
        std = jnp.sqrt(jnp.mean((h - mean) ** 2, axis=-1, keepdims=True))
        return g[0] * ((h - mean) / (std + EPS)) + b[0]

    h1 = ln(x + proj, p["gamma1"], p["beta1"])
    ff = jnp.maximum(h1 @ p["w1"].T + p["b1"][0], 0.0) @ p["w2"].T + p["b2"][0]
    return ln(h1 + ff, p["gamma2"], p["beta2"])


def make_params(key):
    ks = jax.random.split(key, 16)
    f32 = jnp.float32
    return {
        "wq": jax.random.normal(ks[0], (NHEAD, D_HEAD, D_MODEL), f32) * 0.2,
        "bq": jax.random.normal(ks[1], (NHEAD, D_HEAD), f32) * 0.1,
        "wk": jax.random.normal(ks[2], (NHEAD, D_HEAD, D_MODEL), f32) * 0.2,
        "bk": jax.random.normal(ks[3], (NHEAD, D_HEAD), f32) * 0.1,
        "wv": jax.random.normal(ks[4], (NHEAD, D_HEAD, D_MODEL), f32) * 0.2,
        "bv": jax.random.normal(ks[5], (NHEAD, D_HEAD), f32) * 0.1,
        "wo": jax.random.normal(ks[6], (D_MODEL, D_MODEL), f32) * 0.2,
        "bo": jax.random.normal(ks[7], (1, D_MODEL), f32) * 0.1,
        "gamma1": 1.0 + 0.1 * jax.random.normal(ks[8], (1, D_MODEL), f32),
        "beta1": 0.1 * jax.random.normal(ks[9], (1, D_MODEL), f32),
        "w1": jax.random.normal(ks[10], (2 * D_MODEL, D_MODEL), f32) * 0.2,
        "b1": 0.1 * jax.random.normal(ks[11], (1, 2 * D_MODEL), f32),
        "w2": jax.random.normal(ks[12], (D_MODEL, 2 * D_MODEL), f32) * 0.2,
        "b2": 0.1 * jax.random.normal(ks[13], (1, D_MODEL), f32),
        "gamma2": 1.0 + 0.1 * jax.random.normal(ks[14], (1, D_MODEL), f32),
        "beta2": 0.1 * jax.random.normal(ks[15], (1, D_MODEL), f32),
    }


if __name__ == "__main__":
    key = jax.random.PRNGKey(0)
    k_x, k_p = jax.random.split(key)
    B, S = 2, 8
    x = jax.random.normal(k_x, (B, S, D_MODEL), jnp.float32)
    params = make_params(k_p)

    # Setup-time (once-per-model) work: pack weights + build the batch mask OUTSIDE
    # the jitted per-call path, then reuse across calls.
    slab = jax.block_until_ready(pack_params(params))
    mask_bias = make_block_diag_bias(B, S)

    out = jax.block_until_ready(simple_encoder_pallas(x, slab, mask_bias))

    with jax.default_matmul_precision("float32"):
        ref = jax.block_until_ready(simple_encoder_ref(x, params))

    np.testing.assert_allclose(np.asarray(out), np.asarray(ref), rtol=1e-4, atol=1e-4)
    print("KERNEL_OK")
</pallas_src>

<mosaic_0001>
module attributes {stable_mosaic.version = 11 : i64} {
  func.func @_encoder_kernel(%arg0: memref<16x6xf32, #tpu.memory_space<vmem>>, %arg1: memref<56x18xf32, #tpu.memory_space<vmem>>, %arg2: memref<16x16xf32, #tpu.memory_space<vmem>>, %arg3: memref<16x6xf32, #tpu.memory_space<vmem>>) attributes {dimension_semantics = [], scalar_prefetch = 0 : i64, scratch_operands = 0 : i64, tpu.core_type = #tpu.core_type<tc>} {
    %c0 = arith.constant 0 : index
    %c0_0 = arith.constant 0 : index
    %0 = vector.load %arg0[%c0, %c0_0] : memref<16x6xf32, #tpu.memory_space<vmem>>, vector<16x6xf32>
    %c0_1 = arith.constant 0 : index
    %c0_2 = arith.constant 0 : index
    %1 = vector.load %arg2[%c0_1, %c0_2] : memref<16x16xf32, #tpu.memory_space<vmem>>, vector<16x16xf32>
    %c0_3 = arith.constant 0 : index
    %c0_4 = arith.constant 0 : index
    %2 = vector.load %arg1[%c0_3, %c0_4] : memref<56x18xf32, #tpu.memory_space<vmem>>, vector<6x18xf32>
    %c8 = arith.constant 8 : index
    %c0_5 = arith.constant 0 : index
    %3 = vector.load %arg1[%c8, %c0_5] : memref<56x18xf32, #tpu.memory_space<vmem>>, vector<1x18xf32>
    %cst = arith.constant dense<0.000000e+00> : vector<16x18xf32>
    %4 = tpu.matmul %0, %2, %cst {dimension_numbers = #tpu.dot_dimension_numbers<[1], [0], [0], [1], [0, 0, 1, 1], [], []>} : vector<16x6xf32>, vector<6x18xf32>, vector<16x18xf32> -> vector<16x18xf32>
    %5 = vector.broadcast %3 : vector<1x18xf32> to vector<16x18xf32>
    %6 = arith.addf %4, %5 : vector<16x18xf32>
    %c9 = arith.constant 9 : index
    %c0_6 = arith.constant 0 : index
    %7 = vector.load %arg1[%c9, %c0_6] : memref<56x18xf32, #tpu.memory_space<vmem>>, vector<1x6xf32>
    %8 = vector.extract_strided_slice %6 {offsets = [0, 0], sizes = [16, 3], strides = [1, 1]} : vector<16x18xf32> to vector<16x3xf32>
    %9 = vector.extract_strided_slice %6 {offsets = [0, 6], sizes = [16, 3], strides = [1, 1]} : vector<16x18xf32> to vector<16x3xf32>
    %10 = vector.extract_strided_slice %6 {offsets = [0, 12], sizes = [16, 3], strides = [1, 1]} : vector<16x18xf32> to vector<16x3xf32>
    %cst_7 = arith.constant dense<0.000000e+00> : vector<16x16xf32>
    %11 = tpu.matmul %8, %9, %cst_7 {dimension_numbers = #tpu.dot_dimension_numbers<[1], [1], [0], [0], [0, 0, 1, 0], [], []>} : vector<16x3xf32>, vector<16x3xf32>, vector<16x16xf32> -> vector<16x16xf32>
    %12 = arith.addf %11, %1 : vector<16x16xf32>
    %cst_8 = arith.constant dense<0xFF800000> : vector<16xf32>
    %13 = vector.multi_reduction <maximumf>, %12, %cst_8 [1] : vector<16x16xf32> to vector<16xf32>
    %14 = vector.shape_cast %13 : vector<16xf32> to vector<16x1xf32>
    %15 = vector.broadcast %14 : vector<16x1xf32> to vector<16x16xf32>
    %16 = arith.subf %12, %15 : vector<16x16xf32>
    %17 = math.exp %16 : vector<16x16xf32>
    %cst_9 = arith.constant dense<0.000000e+00> : vector<16xf32>
    %18 = vector.multi_reduction <add>, %17, %cst_9 [1] : vector<16x16xf32> to vector<16xf32>
    %19 = vector.shape_cast %18 : vector<16xf32> to vector<16x1xf32>
    %20 = vector.broadcast %19 : vector<16x1xf32> to vector<16x16xf32>
    %21 = arith.divf %17, %20 : vector<16x16xf32>
    %cst_10 = arith.constant dense<0.000000e+00> : vector<16x3xf32>
    %22 = tpu.matmul %21, %10, %cst_10 {dimension_numbers = #tpu.dot_dimension_numbers<[1], [0], [0], [1], [0, 0, 1, 1], [], []>} : vector<16x16xf32>, vector<16x3xf32>, vector<16x3xf32> -> vector<16x3xf32>
    %c16 = arith.constant 16 : index
    %c0_11 = arith.constant 0 : index
    %23 = vector.load %arg1[%c16, %c0_11] : memref<56x18xf32, #tpu.memory_space<vmem>>, vector<3x6xf32>
    %cst_12 = arith.constant dense<0.000000e+00> : vector<16x6xf32>
    %24 = tpu.matmul %22, %23, %cst_12 {dimension_numbers = #tpu.dot_dimension_numbers<[1], [0], [0], [1], [0, 0, 1, 1], [], []>} : vector<16x3xf32>, vector<3x6xf32>, vector<16x6xf32> -> vector<16x6xf32>
    %25 = vector.broadcast %7 : vector<1x6xf32> to vector<16x6xf32>
    %26 = arith.addf %25, %24 : vector<16x6xf32>
    %27 = vector.extract_strided_slice %6 {offsets = [0, 3], sizes = [16, 3], strides = [1, 1]} : vector<16x18xf32> to vector<16x3xf32>
    %28 = vector.extract_strided_slice %6 {offsets = [0, 9], sizes = [16, 3], strides = [1, 1]} : vector<16x18xf32> to vector<16x3xf32>
    %29 = vector.extract_strided_slice %6 {offsets = [0, 15], sizes = [16, 3], strides = [1, 1]} : vector<16x18xf32> to vector<16x3xf32>
    %cst_13 = arith.constant dense<0.000000e+00> : vector<16x16xf32>
    %30 = tpu.matmul %27, %28, %cst_13 {dimension_numbers = #tpu.dot_dimension_numbers<[1], [1], [0], [0], [0, 0, 1, 0], [], []>} : vector<16x3xf32>, vector<16x3xf32>, vector<16x16xf32> -> vector<16x16xf32>
    %31 = arith.addf %30, %1 : vector<16x16xf32>
    %cst_14 = arith.constant dense<0xFF800000> : vector<16xf32>
    %32 = vector.multi_reduction <maximumf>, %31, %cst_14 [1] : vector<16x16xf32> to vector<16xf32>
    %33 = vector.shape_cast %32 : vector<16xf32> to vector<16x1xf32>
    %34 = vector.broadcast %33 : vector<16x1xf32> to vector<16x16xf32>
    %35 = arith.subf %31, %34 : vector<16x16xf32>
    %36 = math.exp %35 : vector<16x16xf32>
    %cst_15 = arith.constant dense<0.000000e+00> : vector<16xf32>
    %37 = vector.multi_reduction <add>, %36, %cst_15 [1] : vector<16x16xf32> to vector<16xf32>
    %38 = vector.shape_cast %37 : vector<16xf32> to vector<16x1xf32>
    %39 = vector.broadcast %38 : vector<16x1xf32> to vector<16x16xf32>
    %40 = arith.divf %36, %39 : vector<16x16xf32>
    %cst_16 = arith.constant dense<0.000000e+00> : vector<16x3xf32>
    %41 = tpu.matmul %40, %29, %cst_16 {dimension_numbers = #tpu.dot_dimension_numbers<[1], [0], [0], [1], [0, 0, 1, 1], [], []>} : vector<16x16xf32>, vector<16x3xf32>, vector<16x3xf32> -> vector<16x3xf32>
    %c24 = arith.constant 24 : index
    %c0_17 = arith.constant 0 : index
    %42 = vector.load %arg1[%c24, %c0_17] : memref<56x18xf32, #tpu.memory_space<vmem>>, vector<3x6xf32>
    %cst_18 = arith.constant dense<0.000000e+00> : vector<16x6xf32>
    %43 = tpu.matmul %41, %42, %cst_18 {dimension_numbers = #tpu.dot_dimension_numbers<[1], [0], [0], [1], [0, 0, 1, 1], [], []>} : vector<16x3xf32>, vector<3x6xf32>, vector<16x6xf32> -> vector<16x6xf32>
    %44 = arith.addf %26, %43 : vector<16x6xf32>
    %45 = arith.addf %0, %44 : vector<16x6xf32>
    %c10 = arith.constant 10 : index
    %c0_19 = arith.constant 0 : index
    %46 = vector.load %arg1[%c10, %c0_19] : memref<56x18xf32, #tpu.memory_space<vmem>>, vector<1x6xf32>
    %c11 = arith.constant 11 : index
    %c0_20 = arith.constant 0 : index
    %47 = vector.load %arg1[%c11, %c0_20] : memref<56x18xf32, #tpu.memory_space<vmem>>, vector<1x6xf32>
    %cst_21 = arith.constant dense<0.000000e+00> : vector<16xf32>
    %48 = vector.multi_reduction <add>, %45, %cst_21 [1] : vector<16x6xf32> to vector<16xf32>
    %49 = vector.shape_cast %48 : vector<16xf32> to vector<16x1xf32>
    %cst_22 = arith.constant 6.000000e+00 : f32
    %50 = vector.broadcast %cst_22 : f32 to vector<16x1xf32>
    %51 = arith.divf %49, %50 : vector<16x1xf32>
    %52 = vector.broadcast %51 : vector<16x1xf32> to vector<16x6xf32>
    %53 = arith.subf %45, %52 : vector<16x6xf32>
    %54 = arith.mulf %53, %53 : vector<16x6xf32>
    %cst_23 = arith.constant dense<0.000000e+00> : vector<16xf32>
    %55 = vector.multi_reduction <add>, %54, %cst_23 [1] : vector<16x6xf32> to vector<16xf32>
    %56 = vector.shape_cast %55 : vector<16xf32> to vector<16x1xf32>
    %cst_24 = arith.constant 6.000000e+00 : f32
    %57 = vector.broadcast %cst_24 : f32 to vector<16x1xf32>
    %58 = arith.divf %56, %57 : vector<16x1xf32>
    %59 = vector.broadcast %51 : vector<16x1xf32> to vector<16x6xf32>
    %60 = arith.subf %45, %59 : vector<16x6xf32>
    %61 = math.sqrt %58 : vector<16x1xf32>
    %cst_25 = arith.constant 9.99999974E-6 : f32
    %62 = vector.broadcast %cst_25 : f32 to vector<16x1xf32>
    %63 = arith.addf %61, %62 : vector<16x1xf32>
    %64 = vector.broadcast %63 : vector<16x1xf32> to vector<16x6xf32>
    %65 = arith.divf %60, %64 : vector<16x6xf32>
    %66 = vector.broadcast %46 : vector<1x6xf32> to vector<16x6xf32>
    %67 = arith.mulf %66, %65 : vector<16x6xf32>
    %68 = vector.broadcast %47 : vector<1x6xf32> to vector<16x6xf32>
    %69 = arith.addf %67, %68 : vector<16x6xf32>
    %c32 = arith.constant 32 : index
    %c0_26 = arith.constant 0 : index
    %70 = vector.load %arg1[%c32, %c0_26] : memref<56x18xf32, #tpu.memory_space<vmem>>, vector<6x12xf32>
    %c12 = arith.constant 12 : index
    %c0_27 = arith.constant 0 : index
    %71 = vector.load %arg1[%c12, %c0_27] : memref<56x18xf32, #tpu.memory_space<vmem>>, vector<1x12xf32>
    %cst_28 = arith.constant dense<0.000000e+00> : vector<16x12xf32>
    %72 = tpu.matmul %69, %70, %cst_28 {dimension_numbers = #tpu.dot_dimension_numbers<[1], [0], [0], [1], [0, 0, 1, 1], [], []>} : vector<16x6xf32>, vector<6x12xf32>, vector<16x12xf32> -> vector<16x12xf32>
    %73 = vector.broadcast %71 : vector<1x12xf32> to vector<16x12xf32>
    %74 = arith.addf %72, %73 : vector<16x12xf32>
    %cst_29 = arith.constant 0.000000e+00 : f32
    %75 = vector.broadcast %cst_29 : f32 to vector<16x12xf32>
    %76 = arith.maximumf %74, %75 : vector<16x12xf32>
    %c40 = arith.constant 40 : index
    %c0_30 = arith.constant 0 : index
    %77 = vector.load %arg1[%c40, %c0_30] : memref<56x18xf32, #tpu.memory_space<vmem>>, vector<12x6xf32>
    %c13 = arith.constant 13 : index
    %c0_31 = arith.constant 0 : index
    %78 = vector.load %arg1[%c13, %c0_31] : memref<56x18xf32, #tpu.memory_space<vmem>>, vector<1x6xf32>
    %cst_32 = arith.constant dense<0.000000e+00> : vector<16x6xf32>
    %79 = tpu.matmul %76, %77, %cst_32 {dimension_numbers = #tpu.dot_dimension_numbers<[1], [0], [0], [1], [0, 0, 1, 1], [], []>} : vector<16x12xf32>, vector<12x6xf32>, vector<16x6xf32> -> vector<16x6xf32>
    %80 = vector.broadcast %78 : vector<1x6xf32> to vector<16x6xf32>
    %81 = arith.addf %79, %80 : vector<16x6xf32>
    %82 = arith.addf %69, %81 : vector<16x6xf32>
    %c14 = arith.constant 14 : index
    %c0_33 = arith.constant 0 : index
    %83 = vector.load %arg1[%c14, %c0_33] : memref<56x18xf32, #tpu.memory_space<vmem>>, vector<1x6xf32>
    %c15 = arith.constant 15 : index
    %c0_34 = arith.constant 0 : index
    %84 = vector.load %arg1[%c15, %c0_34] : memref<56x18xf32, #tpu.memory_space<vmem>>, vector<1x6xf32>
    %cst_35 = arith.constant dense<0.000000e+00> : vector<16xf32>
    %85 = vector.multi_reduction <add>, %82, %cst_35 [1] : vector<16x6xf32> to vector<16xf32>
    %86 = vector.shape_cast %85 : vector<16xf32> to vector<16x1xf32>
    %cst_36 = arith.constant 6.000000e+00 : f32
    %87 = vector.broadcast %cst_36 : f32 to vector<16x1xf32>
    %88 = arith.divf %86, %87 : vector<16x1xf32>
    %89 = vector.broadcast %88 : vector<16x1xf32> to vector<16x6xf32>
    %90 = arith.subf %82, %89 : vector<16x6xf32>
    %91 = arith.mulf %90, %90 : vector<16x6xf32>
    %cst_37 = arith.constant dense<0.000000e+00> : vector<16xf32>
    %92 = vector.multi_reduction <add>, %91, %cst_37 [1] : vector<16x6xf32> to vector<16xf32>
    %93 = vector.shape_cast %92 : vector<16xf32> to vector<16x1xf32>
    %cst_38 = arith.constant 6.000000e+00 : f32
    %94 = vector.broadcast %cst_38 : f32 to vector<16x1xf32>
    %95 = arith.divf %93, %94 : vector<16x1xf32>
    %96 = vector.broadcast %88 : vector<16x1xf32> to vector<16x6xf32>
    %97 = arith.subf %82, %96 : vector<16x6xf32>
    %98 = math.sqrt %95 : vector<16x1xf32>
    %cst_39 = arith.constant 9.99999974E-6 : f32
    %99 = vector.broadcast %cst_39 : f32 to vector<16x1xf32>
    %100 = arith.addf %98, %99 : vector<16x1xf32>
    %101 = vector.broadcast %100 : vector<16x1xf32> to vector<16x6xf32>
    %102 = arith.divf %97, %101 : vector<16x6xf32>
    %103 = vector.broadcast %83 : vector<1x6xf32> to vector<16x6xf32>
    %104 = arith.mulf %103, %102 : vector<16x6xf32>
    %105 = vector.broadcast %84 : vector<1x6xf32> to vector<16x6xf32>
    %106 = arith.addf %104, %105 : vector<16x6xf32>
    %c0_40 = arith.constant 0 : index
    %c0_41 = arith.constant 0 : index
    %107 = vector.load %arg3[%c0_40, %c0_41] : memref<16x6xf32, #tpu.memory_space<vmem>>, vector<16x6xf32>
    tpu.vector_store %arg3[%c0_40, %c0_41], %106 {strides = array<i32>} : memref<16x6xf32, #tpu.memory_space<vmem>>, vector<16x6xf32>,
    return
  }
}

</mosaic_0001>

<bundles_post_ra>
// kernel: simple_encoder_pallas.1
= control target key start
LH: loop header
LB: loop body
LE: loop exit
PB: predicated region body
PF: predicated region fallthrough
CT: control target
= control target key end

     0   :  { %vm28_vm0 = vcmask 1045504   ;;  %vm21_vm1 = vcmask 48128   ;;  %s718_s20 = smov 125   ;;  %s720_s21 = smov 122   ;;  %vm62_vm2 = vcmask 23552   ;;  %vm94_vm3 = vcmask 130048   ;;  %s884_s1 = inlined_call_operand.vmem [shape: f32[56,18], index: 1, kind: input, shape index: {}]   ;;  %s885_s0 = inlined_call_operand.vmem [shape: f32[16,6], index: 0, kind: input, shape index: {}]   ;;  %s886_s2 = inlined_call_operand.vmem [shape: f32[16,16], index: 2, kind: input, shape index: {}]   ;;  %s887_s3 = inlined_call_operand.vmem [shape: f32[16,6], index: 3, kind: output, shape index: {}]  }
   0x1   :  { %v18_v0 = vld [vmem:[%s884_s1] sm:$0x3f]  ;;  %v755_v2 = vld [vmem:[%s885_s0 + $0x8] sm:$0xff]  ;;  %s721_s26 = smov 116   ;;  %v178_v51 = vld [vmem:[%s884_s1 + $0x10] sm:$0x7] }
   0x2   :  { %v750_v1 = vld [vmem:[%s885_s0] sm:$0xff]  ;;  %632 = vmatpush.msk.msra.mxu0 %vm28_vm0, %v18_v0  ;;  %659 = vmatpush.msk.msra.mxu3 %vm28_vm0, %v18_v0  ;;  %v676_v3 = vld [vmem:[%s884_s1 + $0x8] ss:$0 sm:$0xff]  ;;  %s719_s0 = smov 119   ;;  %vm185_vm4 = vcmask 1042432  }
   0x3   :  { %633 = vmatmul.msk.f32.vlgmr.msra.gmra.mxu0 %vm21_vm1, %v750_v1  ;;  %634 = vmatmul.msk.f32.vlgmr.msra.gmra.mxu3 %vm21_vm1, %v755_v2  ;;  %v16_v14 = vld [vmem:[%s886_s2] sm:$0xff]  ;;  %v17_v18 = vld [vmem:[%s886_s2 + $0x8] sm:$0xff]  ;;  %s722_s2 = smov 113  }
   0x4   :  { %641 = vmatpush.msk.msrb.mxu3 %vm185_vm4, %v178_v51 }
  0x80   :  { %v49_v4 = vpop.f32.mrf.mxu0 }
  0x81   :  { %v50_v5 = vadd.f32 %v676_v3, %v49_v4 }
  0x83   :  { %215 = vrot.lane.b32.xlu2 %v50_v5, %s718_s20 }
  0x86   :  { %v52_v6 = vpop.f32.mrf.mxu3 }
  0x87   :  { %v53_v7 = vadd.f32 %v676_v3, %v52_v6 }
  0x89   :  { %221 = vrot.lane.b32.xlu1 %v53_v7, %s719_s0  ;;  %60 = vrot.lane.b32.xlu0 %v53_v7, %s720_s21  ;;  %v666_v25 = vpack.i.bf16 %v50_v5, %v53_v7 }
  0x8b   :  { %217 = vrot.lane.b32.xlu2 %v53_v7, %s718_s20 }
  0x91   :  { %219 = vrot.lane.b32.xlu1 %v50_v5, %s719_s0  ;;  %58 = vrot.lane.b32.xlu0 %v50_v5, %s720_s21 }
  0xdd   :  { %v216_v12 = vpop.permute.xlu2 %215 }
  0xe5   :  { %v218_v13 = vpop.permute.xlu2 %217 }
  0xfb   :  { %v222_v8 = vpop.permute.xlu1 %221  ;;  %v61_v9 = vpop.permute.xlu0 %60 }
  0xfc   :  { %635 = vmatpush.xpose.msk.msra.mxu1 %vm62_vm2, %v61_v9  ;;  %644 = vmatpush.xpose.msk.msrb.mxu0 %vm62_vm2, %v222_v8 }
 0x103   :  { %v220_v10 = vpop.permute.xlu1 %219  ;;  %v59_v11 = vpop.permute.xlu0 %58 }
 0x104   :  { %636 = vmatpush.xpose.msk.msra.mxu1 %vm62_vm2, %v59_v11  ;;  %645 = vmatpush.xpose.msk.msrb.mxu0 %vm62_vm2, %v220_v10 }
 0x107   :  { %637 = vmatmul.msk.f32.vlgmr.msra.gmra.mxu1 %vm62_vm2, %v50_v5  ;;  %646 = vmatmul.msk.f32.vlgmr.msrb.gmra.mxu0 %vm62_vm2, %v216_v12 }
 0x10f   :  { %638 = vmatmul.msk.f32.gmra.mxu1 %vm62_vm2, %v53_v7  ;;  %647 = vmatmul.msk.f32.gmra.mxu0 %vm62_vm2, %v218_v13 }
 0x184   :  { %v88_v15 = vpop.f32.mrf.mxu1  ;;  %v248_v22 = vpop.f32.mrf.mxu0 }
 0x185   :  { %v89_v16 = vadd.f32 %v88_v15, %v16_v14  ;;  %v249_v23 = vadd.f32 %v248_v22, %v16_v14 }
 0x187   :  { %v95_v17 = vsel %vm94_vm3, %v89_v16, -inf  ;;  %v254_v24 = vsel %vm94_vm3, %v249_v23, -inf }
 0x188   :  { %96 = vmax.xlane.f32.xlu0 %v95_v17 }
 0x18c   :  { %v91_v19 = vpop.f32.mrf.mxu1  ;;  %v251_v41 = vpop.f32.mrf.mxu0 }
 0x18d   :  { %v92_v20 = vadd.f32 %v91_v19, %v17_v18  ;;  %v252_v43 = vadd.f32 %v251_v41, %v17_v18 }
 0x18f   :  { %v98_v21 = vsel %vm94_vm3, %v92_v20, -inf  ;;  %v257_v46 = vsel %vm94_vm3, %v252_v43, -inf }
 0x190   :  { %99 = vmax.xlane.f32.xlu1 %v98_v21 }
 0x198   :  { %255 = vmax.xlane.f32.xlu1 %v254_v24 }
 0x19c   :  { %667 = vrot.lane.b32.xlu0 %v666_v25, %s721_s26 }
 0x1fb   :  { %v97_v26 = vpop.xlane.xlu0 %96 }
 0x1fc   :  { %v101_v27 = vsub.f32 %v89_v16, %v97_v26 }
 0x1fe   :  { %v103_v28 = vmul.f32 1.442695, %v101_v27 }
 0x200   :  { %684 = vpow2.f32 %v103_v28 }
 0x203   :  { %v100_v29 = vpop.xlane.xlu1 %99 }
 0x204   :  { %v102_v30 = vsub.f32 %v92_v20, %v100_v29 }
 0x206   :  { %v685_v31 = vpop.eup %684  ;;  %v105_v32 = vmul.f32 1.442695, %v102_v30 }
 0x207   :  { %v107_v33 = vsel %vm94_vm3, %v685_v31, 0.0 }
 0x208   :  { %686 = vpow2.f32 %v105_v32  ;;  %108 = vadd.xlane.f32.xlu2 %v107_v33 }
 0x20b   :  { %v256_v34 = vpop.xlane.xlu1 %255 }
 0x20c   :  { %v260_v35 = vsub.f32 %v249_v23, %v256_v34 }
 0x20e   :  { %v687_v36 = vpop.eup %686  ;;  %v262_v37 = vmul.f32 1.442695, %v260_v35  ;;  %v668_v38 = vpop.permute.xlu0 %667 }
 0x20f   :  { %v110_v39 = vsel %vm94_vm3, %v687_v36, 0.0  ;;  %v669_v40 = vunpack.i.l.bf16 %v668_v38  ;;  %v670_v42 = vunpack.i.h.bf16 %v668_v38 }
 0x210   :  { %688 = vpow2.f32 %v262_v37  ;;  %111 = vadd.xlane.f32.xlu2 %v110_v39 }
 0x211   :  { %169 = vmatpush.msra.mxu2 %v669_v40 }
 0x213   :  { %170 = vmatpush.msra.mxu2 %v670_v42 }
 0x216   :  { %v785_v44 = vpop.eup %688 }
 0x217   :  { %v266_v45 = vsel %vm94_vm3, %v785_v44, 0.0 }
 0x218   :  { %267 = vadd.xlane.f32.xlu1 %v266_v45  ;;  %258 = vmax.xlane.f32.xlu2 %v257_v46  ;;  %v337_v45 = vld [vmem:[%s884_s1 + $0x18] sm:$0x7] }
 0x219   :  { %650 = vmatpush.msk.msrb.mxu2 %vm185_vm4, %v337_v45  ;;  %vm513_vm4 = vcmask 1043456  }
 0x231   :  { %672 = vrot.lane.b32.xlu1 %v666_v25, %s722_s2 }
 0x27b   :  { %v109_v47 = vpop.xlane.xlu2 %108 }
 0x27c   :  { %690 = vrcp.f32 %v109_v47  ;;  %v124_v54 = vand.u32 2147483648, %v109_v47  ;;  %v122_v55 = vand.u32 2147483647, %v109_v47  ;;  %vm118_vm6 = vweird.f32 %v109_v47 }
 0x27e   :  { %v125_v58 = vor.u32 1.1754944e-38, %v124_v54  ;;  %vm123_vm8 = vcmp.eq.f32.partialorder %v122_v55, 8.507059e+37 }
 0x282   :  { %v691_v48 = vpop.eup %690 }
 0x283   :  { %v114_v49 = vmul.f32 %v691_v48, %v109_v47  ;;  %v112_v50 = vpop.xlane.xlu2 %111  ;;  %vm119_vm5 = vweird.f32 %v691_v48 }
 0x284   :  { %692 = vrcp.f32 %v112_v50  ;;  %vm120_vm7 = vmor %vm118_vm6, %vm119_vm5  ;;  %v139_v3 = vand.u32 2147483648, %v112_v50  ;;  %v137_v7 = vand.u32 2147483647, %v112_v50  ;;  %vm133_vm10 = vweird.f32 %v112_v50 }
 0x285   :  { %v115_v52 = vsub.f32 1.0, %v114_v49  ;;  %v677_v49 = vld [vmem:[%s884_s1 + $0x9] ss:$0 sm:$0xff] }
 0x286   :  { %v140_v9 = vor.u32 1.1754944e-38, %v139_v3  ;;  %vm138_vm12 = vcmp.eq.f32.partialorder %v137_v7, 8.507059e+37 }
 0x287   :  { %v116_v53 = vmul.f32 %v691_v48, %v115_v52 }
 0x289   :  { %v117_v56 = vadd.f32 %v691_v48, %v116_v53 }
 0x28a   :  { %v693_v57 = vpop.eup %692 }
 0x28b   :  { %v129_v59 = vmul.f32 %v693_v57, %v112_v50  ;;  %v259_v60 = vpop.xlane.xlu2 %258  ;;  %v121_v61 = vsel %vm120_vm7, %v691_v48, %v117_v56  ;;  %vm134_vm9 = vweird.f32 %v693_v57  ;;  %v268_v15 = vpop.xlane.xlu1 %267 }
 0x28c   :  { %v261_v63 = vsub.f32 %v252_v43, %v259_v60  ;;  %v126_v0 = vsel %vm123_vm8, %v125_v58, %v121_v61  ;;  %vm135_vm11 = vmor %vm133_vm10, %vm134_vm9  ;;  %v283_v29 = vand.u32 2147483648, %v268_v15  ;;  %vm277_vm14 = vweird.f32 %v268_v15 }
 0x28d   :  { %v130_v62 = vsub.f32 1.0, %v129_v59  ;;  %v127_v4 = vmul.f32 %v685_v31, %v126_v0  ;;  %v281_v30 = vand.u32 2147483647, %v268_v15  ;;  %v723_v60 = vmov 6.0  }
 0x28e   :  { %v264_v6 = vmul.f32 1.442695, %v261_v63  ;;  %v284_v34 = vor.u32 1.1754944e-38, %v283_v29 }
 0x28f   :  { %v131_v5 = vmul.f32 %v693_v57, %v130_v62  ;;  %639 = vmatmul.msk.f32.vlgmr.msra.gmra.mxu2 %vm94_vm3, %v127_v4  ;;  %vm282_vm5 = vcmp.eq.f32.partialorder %v281_v30, 8.507059e+37 }
 0x290   :  { %694 = vpow2.f32 %v264_v6 }
 0x291   :  { %v132_v8 = vadd.f32 %v693_v57, %v131_v5  ;;  %696 = vrcp.f32 %v268_v15 }
 0x293   :  { %v136_v10 = vsel %vm135_vm11, %v693_v57, %v132_v8 }
 0x294   :  { %v141_v11 = vsel %vm138_vm12, %v140_v9, %v136_v10 }
 0x295   :  { %v142_v12 = vmul.f32 %v687_v36, %v141_v11 }
 0x296   :  { %v695_v13 = vpop.eup %694 }
 0x297   :  { %640 = vmatmul.msk.f32.gmra.mxu2 %vm94_vm3, %v142_v12  ;;  %v269_v14 = vsel %vm94_vm3, %v695_v13, 0.0  ;;  %v697_v19 = vpop.eup %696 }
 0x298   :  { %270 = vadd.xlane.f32.xlu2 %v269_v14  ;;  %v273_v20 = vmul.f32 %v697_v19, %v268_v15  ;;  %vm278_vm13 = vweird.f32 %v697_v19 }
 0x299   :  { %vm279_vm15 = vmor %vm277_vm14, %vm278_vm13 }
 0x29a   :  { %v274_v22 = vsub.f32 1.0, %v273_v20 }
 0x29c   :  { %v275_v25 = vmul.f32 %v697_v19, %v274_v22 }
 0x29e   :  { %v276_v27 = vadd.f32 %v697_v19, %v275_v25 }
 0x2a0   :  { %v280_v32 = vsel %vm279_vm15, %v697_v19, %v276_v27 }
 0x2a1   :  { %v285_v35 = vsel %vm282_vm5, %v284_v34, %v280_v32  ;;  %v503_v34 = vld [vmem:[%s884_s1 + $0x30] sm:$0xf] }
 0x2a2   :  { %v286_v38 = vmul.f32 %v785_v44, %v285_v35  ;;  %v502_v35 = vld [vmem:[%s884_s1 + $0x28] sm:$0xff]  ;;  %656 = vmatpush.msk.msra.mxu0 %vm513_vm4, %v503_v34 }
 0x2a3   :  { %v673_v16 = vpop.permute.xlu1 %672 }
 0x2a4   :  { %v674_v17 = vunpack.i.l.bf16 %v673_v16  ;;  %v675_v18 = vunpack.i.h.bf16 %v673_v16  ;;  %532 = vmatpush.msra.mxu0 %v502_v35 }
 0x2a6   :  { %328 = vmatpush.msra.mxu3 %v674_v17 }
 0x2a8   :  { %329 = vmatpush.msra.mxu3 %v675_v18 }
 0x30b   :  { %v271_v21 = vpop.xlane.xlu2 %270 }
 0x30c   :  { %698 = vrcp.f32 %v271_v21  ;;  %v298_v37 = vand.u32 2147483648, %v271_v21  ;;  %vm292_vm7 = vweird.f32 %v271_v21  ;;  %v296_v39 = vand.u32 2147483647, %v271_v21 }
 0x30d   :  { %700 = vrcp.f32 %v723_v60 }
 0x30e   :  { %v299_v41 = vor.u32 1.1754944e-38, %v298_v37  ;;  %vm297_vm9 = vcmp.eq.f32.partialorder %v296_v39, 8.507059e+37 }
 0x312   :  { %v699_v23 = vpop.eup %698  ;;  %v172_v24 = vpop.f32.mrf.mxu2 }
 0x313   :  { %v288_v26 = vmul.f32 %v699_v23, %v271_v21  ;;  %642 = vmatmul.msk.f32.vlgmr.msrb.gmra.mxu3 %vm62_vm2, %v172_v24  ;;  %vm293_vm6 = vweird.f32 %v699_v23  ;;  %v701_v61 = vpop.eup %700 }
 0x314   :  { %vm294_vm8 = vmor %vm292_vm7, %vm293_vm6  ;;  %v383_v62 = vmul.f32 6.0, %v701_v61 }
 0x315   :  { %v289_v28 = vsub.f32 1.0, %v288_v26 }
 0x316   :  { %v384_v63 = vsub.f32 1.0, %v383_v62 }
 0x317   :  { %v290_v33 = vmul.f32 %v699_v23, %v289_v28 }
 0x318   :  { %v385_v0 = vmul.f32 %v701_v61, %v384_v63 }
 0x319   :  { %v291_v36 = vadd.f32 %v699_v23, %v290_v33 }
 0x31a   :  { %v175_v31 = vpop.f32.mrf.mxu2  ;;  %v386_v3 = vadd.f32 %v701_v61, %v385_v0 }
 0x31b   :  { %643 = vmatmul.msk.f32.gmra.mxu3 %vm62_vm2, %v175_v31  ;;  %v295_v40 = vsel %vm294_vm8, %v699_v23, %v291_v36 }
 0x31c   :  { %v300_v42 = vsel %vm297_vm9, %v299_v41, %v295_v40  ;;  %vm506_vm9 = vcmask 97280  }
 0x31d   :  { %v301_v43 = vmul.f32 %v695_v13, %v300_v42  ;;  %v465_v13 = vld [vmem:[%s884_s1 + $0x20] sm:$0x3f] }
 0x31e   :  { %653 = vmatpush.msk.msrb.mxu1 %vm28_vm0, %v465_v13 }
 0x323   :  { %648 = vmatmul.msk.f32.vlgmr.msra.gmra.mxu3 %vm94_vm3, %v286_v38 }
 0x32b   :  { %649 = vmatmul.msk.f32.gmra.mxu3 %vm94_vm3, %v301_v43 }
 0x396   :  { %v206_v46 = vpop.f32.mrf.mxu3 }
 0x397   :  { %v213_v50 = vadd.f32 %v677_v49, %v206_v46 }
 0x39e   :  { %v209_v47 = vpop.f32.mrf.mxu3 }
 0x39f   :  { %v214_v55 = vadd.f32 %v677_v49, %v209_v47 }
 0x3a6   :  { %v331_v44 = vpop.f32.mrf.mxu3 }
 0x3a7   :  { %651 = vmatmul.msk.f32.vlgmr.msrb.gmra.mxu2 %vm62_vm2, %v331_v44 }
 0x3ae   :  { %v334_v48 = vpop.f32.mrf.mxu3 }
 0x3af   :  { %652 = vmatmul.msk.f32.gmra.mxu2 %vm62_vm2, %v334_v48  ;;  %vm387_vm2 = vweird.f32 %v701_v61 }
 0x42a   :  { %v364_v51 = vpop.f32.mrf.mxu2 }
 0x42b   :  { %v370_v52 = vadd.f32 %v364_v51, %v213_v50 }
 0x42d   :  { %v372_v53 = vadd.f32 %v370_v52, %v750_v1  ;;  %v815_v1 = vsel %vm387_vm2, %v701_v61, %v386_v3  ;;  %v678_v52 = vld [vmem:[%s884_s1 + $0xa] ss:$0 sm:$0xff] }
 0x42f   :  { %v376_v54 = vsel %vm21_vm1, %v372_v53, 0.0 }
 0x430   :  { %377 = vadd.xlane.f32.xlu0 %v376_v54 }
 0x432   :  { %v367_v56 = vpop.f32.mrf.mxu2 }
 0x433   :  { %v371_v57 = vadd.f32 %v367_v56, %v214_v55  ;;  %v679_v56 = vld [vmem:[%s884_s1 + $0xb] ss:$0 sm:$0xff] }
 0x435   :  { %v373_v58 = vadd.f32 %v371_v57, %v755_v2 }
 0x437   :  { %v379_v59 = vsel %vm21_vm1, %v373_v58, 0.0 }
 0x438   :  { %380 = vadd.xlane.f32.xlu2 %v379_v59 }
 0x4a3   :  { %v378_v4 = vpop.xlane.xlu0 %377 }
 0x4a4   :  { %v389_v5 = vmul.f32 %v815_v1, %v378_v4 }
 0x4a6   :  { %v818_v6 = vsub.f32 %v372_v53, %v389_v5 }
 0x4a8   :  { %v393_v2 = vmul.f32 %v818_v6, %v818_v6 }
 0x4aa   :  { %v395_v7 = vsel %vm21_vm1, %v393_v2, 0.0 }
 0x4ab   :  { %396 = vadd.xlane.f32.xlu2 %v395_v7  ;;  %v381_v8 = vpop.xlane.xlu2 %380  ;;  %v680_v7 = vld [vmem:[%s884_s1 + $0xc] ss:$0 sm:$0xff] }
 0x4ac   :  { %v390_v9 = vmul.f32 %v815_v1, %v381_v8 }
 0x4ae   :  { %v824_v10 = vsub.f32 %v373_v58, %v390_v9 }
 0x4b0   :  { %v394_v11 = vmul.f32 %v824_v10, %v824_v10 }
 0x4b2   :  { %v398_v12 = vsel %vm21_vm1, %v394_v11, 0.0 }
 0x4b3   :  { %399 = vadd.xlane.f32.xlu2 %v398_v12 }
 0x51e   :  { %v397_v14 = vpop.xlane.xlu2 %396 }
 0x51f   :  { %v401_v15 = vmul.f32 %v397_v14, %v815_v1 }
 0x521   :  { %702 = vrsqrt.f32 %v401_v15  ;;  %vm410_vm3 = vcmp.eq.f32.partialorder %v401_v15, inf  ;;  %v413_v28 = vand.u32 2147483648, %v401_v15  ;;  %vm412_vm0 = vcmp.eq.f32.partialorder %v401_v15, 0.0 }
 0x526   :  { %v400_v16 = vpop.xlane.xlu2 %399 }
 0x527   :  { %v703_v17 = vpop.eup %702  ;;  %v402_v18 = vmul.f32 %v400_v16, %v815_v1 }
 0x528   :  { %v404_v19 = vmul.f32 %v703_v17, %v401_v15 }
 0x529   :  { %704 = vrsqrt.f32 %v402_v18  ;;  %vm422_vm10 = vcmp.eq.f32.partialorder %v402_v18, inf  ;;  %v425_v38 = vand.u32 2147483648, %v402_v18  ;;  %vm424_vm11 = vcmp.eq.f32.partialorder %v402_v18, 0.0 }
 0x52a   :  { %v405_v20 = vmul.f32 %v703_v17, %v404_v19 }
 0x52c   :  { %v406_v21 = vmul.f32 0.5, %v405_v20 }
 0x52e   :  { %v407_v22 = vsub.f32 1.5, %v406_v21 }
 0x52f   :  { %v705_v23 = vpop.eup %704 }
 0x530   :  { %v408_v24 = vmul.f32 %v703_v17, %v407_v22  ;;  %v416_v25 = vmul.f32 %v705_v23, %v402_v18 }
 0x532   :  { %v409_v26 = vmul.f32 %v408_v24, %v401_v15  ;;  %v417_v27 = vmul.f32 %v705_v23, %v416_v25 }
 0x534   :  { %v411_v29 = vsel %vm410_vm3, %v401_v15, %v409_v26  ;;  %v418_v30 = vmul.f32 0.5, %v417_v27 }
 0x535   :  { %v414_v31 = vsel %vm412_vm0, %v413_v28, %v411_v29 }
 0x536   :  { %v427_v32 = vadd.f32 1e-05, %v414_v31  ;;  %v419_v33 = vsub.f32 1.5, %v418_v30 }
 0x538   :  { %706 = vrcp.f32 %v427_v32  ;;  %v420_v36 = vmul.f32 %v705_v23, %v419_v33  ;;  %v440_v46 = vand.u32 2147483648, %v427_v32  ;;  %v438_v44 = vand.u32 2147483647, %v427_v32 }
 0x539   :  { %vm434_vm13 = vweird.f32 %v427_v32 }
 0x53a   :  { %v421_v37 = vmul.f32 %v420_v36, %v402_v18  ;;  %v441_v50 = vor.u32 1.1754944e-38, %v440_v46  ;;  %vm439_vm15 = vcmp.eq.f32.partialorder %v438_v44, 8.507059e+37 }
 0x53c   :  { %v423_v39 = vsel %vm422_vm10, %v402_v18, %v421_v37 }
 0x53d   :  { %v426_v40 = vsel %vm424_vm11, %v425_v38, %v423_v39 }
 0x53e   :  { %v707_v41 = vpop.eup %706  ;;  %v428_v42 = vadd.f32 1e-05, %v426_v40 }
 0x53f   :  { %v430_v43 = vmul.f32 %v707_v41, %v427_v32  ;;  %vm435_vm12 = vweird.f32 %v707_v41 }
 0x540   :  { %708 = vrcp.f32 %v428_v42  ;;  %vm436_vm14 = vmor %vm434_vm13, %vm435_vm12  ;;  %v455_v58 = vand.u32 2147483648, %v428_v42  ;;  %v453_v61 = vand.u32 2147483647, %v428_v42  ;;  %vm449_vm6 = vweird.f32 %v428_v42 }
 0x541   :  { %v431_v45 = vsub.f32 1.0, %v430_v43 }
 0x542   :  { %v456_v0 = vor.u32 1.1754944e-38, %v455_v58  ;;  %vm454_vm8 = vcmp.eq.f32.partialorder %v453_v61, 8.507059e+37 }
 0x543   :  { %v432_v47 = vmul.f32 %v707_v41, %v431_v45 }
 0x545   :  { %v433_v48 = vadd.f32 %v707_v41, %v432_v47 }
 0x546   :  { %v709_v49 = vpop.eup %708 }
 0x547   :  { %v437_v51 = vsel %vm436_vm14, %v707_v41, %v433_v48  ;;  %v445_v53 = vmul.f32 %v709_v49, %v428_v42  ;;  %vm450_vm5 = vweird.f32 %v709_v49 }
 0x548   :  { %v442_v54 = vsel %vm439_vm15, %v441_v50, %v437_v51  ;;  %vm451_vm7 = vmor %vm449_vm6, %vm450_vm5 }
 0x549   :  { %v443_v55 = vmul.f32 %v442_v54, %v818_v6  ;;  %v446_v57 = vsub.f32 1.0, %v445_v53 }
 0x54b   :  { %v460_v59 = vmul.f32 %v678_v52, %v443_v55  ;;  %v447_v60 = vmul.f32 %v709_v49, %v446_v57 }
 0x54d   :  { %v463_v62 = vadd.f32 %v679_v56, %v460_v59  ;;  %v448_v63 = vadd.f32 %v709_v49, %v447_v60 }
 0x54f   :  { %654 = vmatmul.msk.f32.vlgmr.msrb.gmra.mxu1 %vm21_vm1, %v463_v62  ;;  %v452_v3 = vsel %vm451_vm7, %v709_v49, %v448_v63 }
 0x550   :  { %v457_v4 = vsel %vm454_vm8, %v456_v0, %v452_v3 }
 0x551   :  { %v458_v5 = vmul.f32 %v457_v4, %v824_v10  ;;  %v681_v10 = vld [vmem:[%s884_s1 + $0xd] ss:$0 sm:$0xff] }
 0x553   :  { %v461_v6 = vmul.f32 %v678_v52, %v458_v5  ;;  %v682_v5 = vld [vmem:[%s884_s1 + $0xe] ss:$0 sm:$0xff] }
 0x555   :  { %v464_v2 = vadd.f32 %v679_v56, %v461_v6 }
 0x557   :  { %655 = vmatmul.msk.f32.gmra.mxu1 %vm21_vm1, %v464_v2 }
 0x5cc   :  { %v494_v8 = vpop.f32.mrf.mxu1 }
 0x5cd   :  { %v495_v9 = vadd.f32 %v680_v7, %v494_v8  ;;  %v683_v8 = vld [vmem:[%s884_s1 + $0xf] ss:$0 sm:$0xff] }
 0x5cf   :  { %v500_v11 = vmax.f32 %v495_v9, 0.0 }
 0x5d1   :  { %657 = vmatmul.msk.f32.vlgmr.msra.gmra.mxu0 %vm506_vm9, %v500_v11 }
 0x5d4   :  { %v497_v12 = vpop.f32.mrf.mxu1 }
 0x5d5   :  { %v498_v13 = vadd.f32 %v680_v7, %v497_v12 }
 0x5d7   :  { %v501_v14 = vmax.f32 %v498_v13, 0.0 }
 0x5d9   :  { %658 = vmatmul.msk.f32.gmra.mxu0 %vm506_vm9, %v501_v14 }
 0x64e   :  { %v534_v15 = vpop.f32.mrf.mxu0 }
 0x64f   :  { %v535_v16 = vadd.f32 %v681_v10, %v534_v15 }
 0x651   :  { %v540_v17 = vadd.f32 %v535_v16, %v463_v62 }
 0x653   :  { %v544_v18 = vsel %vm21_vm1, %v540_v17, 0.0 }
 0x654   :  { %545 = vadd.xlane.f32.xlu1 %v544_v18 }
 0x656   :  { %v537_v19 = vpop.f32.mrf.mxu0 }
 0x657   :  { %v538_v20 = vadd.f32 %v681_v10, %v537_v19 }
 0x659   :  { %v541_v21 = vadd.f32 %v538_v20, %v464_v2 }
 0x65b   :  { %v547_v22 = vsel %vm21_vm1, %v541_v21, 0.0 }
 0x65c   :  { %548 = vadd.xlane.f32.xlu2 %v547_v22 }
 0x6c7   :  { %v546_v23 = vpop.xlane.xlu1 %545 }
 0x6c8   :  { %v550_v24 = vmul.f32 %v546_v23, %v815_v1 }
 0x6ca   :  { %v552_v25 = vsub.f32 %v540_v17, %v550_v24 }
 0x6cc   :  { %v554_v26 = vmul.f32 %v552_v25, %v552_v25 }
 0x6ce   :  { %v556_v27 = vsel %vm21_vm1, %v554_v26, 0.0 }
 0x6cf   :  { %557 = vadd.xlane.f32.xlu2 %v556_v27  ;;  %v549_v28 = vpop.xlane.xlu2 %548 }
 0x6d0   :  { %v551_v29 = vmul.f32 %v549_v28, %v815_v1 }
 0x6d2   :  { %v862_v30 = vsub.f32 %v541_v21, %v551_v29 }
 0x6d4   :  { %v555_v31 = vmul.f32 %v862_v30, %v862_v30 }
 0x6d6   :  { %v559_v32 = vsel %vm21_vm1, %v555_v31, 0.0 }
 0x6d7   :  { %560 = vadd.xlane.f32.xlu0 %v559_v32 }
 0x742   :  { %v558_v33 = vpop.xlane.xlu2 %557 }
 0x743   :  { %v562_v34 = vmul.f32 %v558_v33, %v815_v1 }
 0x745   :  { %710 = vrsqrt.f32 %v562_v34  ;;  %vm571_vm2 = vcmp.eq.f32.partialorder %v562_v34, inf  ;;  %v574_v44 = vand.u32 2147483648, %v562_v34  ;;  %vm573_vm3 = vcmp.eq.f32.partialorder %v562_v34, 0.0 }
 0x74a   :  { %v561_v35 = vpop.xlane.xlu0 %560 }
 0x74b   :  { %v711_v36 = vpop.eup %710  ;;  %v563_v37 = vmul.f32 %v561_v35, %v815_v1 }
 0x74c   :  { %v565_v38 = vmul.f32 %v711_v36, %v562_v34 }
 0x74d   :  { %712 = vrsqrt.f32 %v563_v37  ;;  %vm583_vm0 = vcmp.eq.f32.partialorder %v563_v37, inf  ;;  %v586_v54 = vand.u32 2147483648, %v563_v37  ;;  %vm585_vm4 = vcmp.eq.f32.partialorder %v563_v37, 0.0 }
 0x74e   :  { %v566_v39 = vmul.f32 %v711_v36, %v565_v38 }
 0x750   :  { %v567_v40 = vmul.f32 0.5, %v566_v39 }
 0x752   :  { %v568_v41 = vsub.f32 1.5, %v567_v40 }
 0x753   :  { %v713_v42 = vpop.eup %712 }
 0x754   :  { %v569_v43 = vmul.f32 %v711_v36, %v568_v41  ;;  %v577_v45 = vmul.f32 %v713_v42, %v563_v37 }
 0x756   :  { %v570_v46 = vmul.f32 %v569_v43, %v562_v34  ;;  %v578_v47 = vmul.f32 %v713_v42, %v577_v45 }
 0x758   :  { %v572_v48 = vsel %vm571_vm2, %v562_v34, %v570_v46  ;;  %v579_v49 = vmul.f32 0.5, %v578_v47 }
 0x759   :  { %v575_v50 = vsel %vm573_vm3, %v574_v44, %v572_v48 }
 0x75a   :  { %v588_v51 = vadd.f32 1e-05, %v575_v50  ;;  %v580_v52 = vsub.f32 1.5, %v579_v49 }
 0x75c   :  { %714 = vrcp.f32 %v588_v51  ;;  %v581_v1 = vmul.f32 %v713_v42, %v580_v52  ;;  %v601_v61 = vand.u32 2147483648, %v588_v51  ;;  %v599_v63 = vand.u32 2147483647, %v588_v51 }
 0x75d   :  { %vm595_vm11 = vweird.f32 %v588_v51 }
 0x75e   :  { %v582_v53 = vmul.f32 %v581_v1, %v563_v37  ;;  %v602_v3 = vor.u32 1.1754944e-38, %v601_v61  ;;  %vm600_vm13 = vcmp.eq.f32.partialorder %v599_v63, 8.507059e+37 }
 0x760   :  { %v584_v55 = vsel %vm583_vm0, %v563_v37, %v582_v53 }
 0x761   :  { %v587_v57 = vsel %vm585_vm4, %v586_v54, %v584_v55 }
 0x762   :  { %v715_v56 = vpop.eup %714  ;;  %v589_v59 = vadd.f32 1e-05, %v587_v57 }
 0x763   :  { %v591_v58 = vmul.f32 %v715_v56, %v588_v51  ;;  %vm596_vm10 = vweird.f32 %v715_v56 }
 0x764   :  { %716 = vrcp.f32 %v589_v59  ;;  %vm597_vm12 = vmor %vm595_vm11, %vm596_vm10  ;;  %v616_v13 = vand.u32 2147483648, %v589_v59  ;;  %v614_v10 = vand.u32 2147483647, %v589_v59  ;;  %vm610_vm15 = vweird.f32 %v589_v59 }
 0x765   :  { %v592_v60 = vsub.f32 1.0, %v591_v58 }
 0x766   :  { %v617_v17 = vor.u32 1.1754944e-38, %v616_v13  ;;  %vm615_vm6 = vcmp.eq.f32.partialorder %v614_v10, 8.507059e+37 }
 0x767   :  { %v593_v62 = vmul.f32 %v715_v56, %v592_v60 }
 0x769   :  { %v594_v0 = vadd.f32 %v715_v56, %v593_v62 }
 0x76a   :  { %v717_v4 = vpop.eup %716 }
 0x76b   :  { %v598_v6 = vsel %vm597_vm12, %v715_v56, %v594_v0  ;;  %v606_v7 = vmul.f32 %v717_v4, %v589_v59  ;;  %vm611_vm14 = vweird.f32 %v717_v4 }
 0x76c   :  { %v603_v2 = vsel %vm600_vm13, %v602_v3, %v598_v6  ;;  %vm612_vm5 = vmor %vm610_vm15, %vm611_vm14 }
 0x76d   :  { %v604_v9 = vmul.f32 %v603_v2, %v552_v25  ;;  %v607_v11 = vsub.f32 1.0, %v606_v7 }
 0x76f   :  { %v621_v12 = vmul.f32 %v682_v5, %v604_v9  ;;  %v608_v14 = vmul.f32 %v717_v4, %v607_v11 }
 0x771   :  { %v624_v15 = vadd.f32 %v683_v8, %v621_v12  ;;  %v609_v16 = vadd.f32 %v717_v4, %v608_v14 }
 0x773   :  { %626 = vst.msk [vmem:[%s887_s3] sm:$0xff] %vm21_vm1, %v624_v15  ;;  %v613_v18 = vsel %vm612_vm5, %v717_v4, %v609_v16 }
 0x774   :  { %v618_v19 = vsel %vm615_vm6, %v617_v17, %v613_v18 }
 0x775   :  { %v619_v20 = vmul.f32 %v618_v19, %v862_v30 }
 0x777   :  { %v622_v21 = vmul.f32 %v682_v5, %v619_v20 }
 0x779   :  { %v625_v22 = vadd.f32 %v683_v8, %v622_v21 }
 0x77b   :  { %627 = vst.msk [vmem:[%s887_s3 + $0x8] sm:$0xff] %vm21_vm1, %v625_v22 }

</bundles_post_ra>
